<compile_context>
chip_gen: v6e
topology: v6e:2x2x1
jax: 0.10.0
libtpu: 0.0.40
codegen_flags: <defaults>
</compile_context>

<pallas_src>
from functools import partial

import jax
import jax.numpy as jnp
from jax.experimental import pallas as pl
from jax.experimental.pallas import tpu as pltpu

HIDDEN = 128
LANE = 128


def _round_up(x, m):
    return ((x + m - 1) // m) * m


def _default_bf16_activations():
    """bf16 bias-add/ReLU only on chips with a bf16 VPU path (v6e/v7x)."""
    try:
        kind = jax.devices()[0].device_kind.lower()
    except Exception:
        return False
    return not any(v in kind for v in ("v2", "v3", "v4", "v5"))


def _make_dqn_kernel(act_dtype):
    def kernel(x_ref, w1_ref, b1_ref, w2_ref, b2_ref, w3_ref, b3_ref, o_ref):
        # fc1: bf16 MXU matmul, f32 accumulate; activations kept in act_dtype
        # (cast right after the dot fuses with the MXU result pop).
        h1 = jnp.dot(x_ref[...], w1_ref[...],
                     preferred_element_type=jnp.float32).astype(act_dtype)
        h1 = jnp.maximum(h1 + b1_ref[...].astype(act_dtype), 0.0)
        # fc2
        h2 = jnp.dot(h1.astype(jnp.bfloat16), w2_ref[...],
                     preferred_element_type=jnp.float32).astype(act_dtype)
        h2 = jnp.maximum(h2 + b2_ref[...].astype(act_dtype), 0.0)
        # fc3 (no activation) -> lane-dense (padded-to-128) f32 output tile.
        o_ref[...] = (
            jnp.dot(h2.astype(jnp.bfloat16), w3_ref[...],
                    preferred_element_type=jnp.float32)
            + b3_ref[...]
        )
    return kernel


@partial(jax.jit,
         static_argnames=("output_dim", "block_batch", "bf16_activations"))
def dqn_forward(x, kparams, *, output_dim, block_batch=1024,
                bf16_activations=False):
    """x: (batch, input_dim) f32.  kparams: prepared (bf16-weight) params."""
    w1, b1, w2, b2, w3, b3 = kparams
    batch, in_dim = x.shape
    n_pad = w3.shape[1]   # padded output dim (multiple of 128)

    # Static batch tile.  Small batches: one step (rounded to 16 sublanes).
    # Large batches: multiple-of-256 tiles with >=2 grid steps (v7x megacore).
    if batch <= 256:
        tb = _round_up(max(batch, 1), 16)
    elif batch < 2 * block_batch:
        tb = _round_up(pl.cdiv(batch, 2), 256)
    else:
        tb = block_batch
    padded_batch = _round_up(batch, tb)

    # bf16 cast + row pad fuse into one small pass inside this jit.
    xb = x.astype(jnp.bfloat16)
    if padded_batch != batch:
        xb = jnp.pad(xb, ((0, padded_batch - batch), (0, 0)))

    act_dtype = jnp.bfloat16 if bf16_activations else jnp.float32
    grid = (padded_batch // tb,)

    weight_bytes = (in_dim * HIDDEN + HIDDEN * HIDDEN + HIDDEN * n_pad) * 2
    cost = pl.CostEstimate(
        flops=2 * padded_batch * (in_dim * HIDDEN + HIDDEN * HIDDEN
                                  + HIDDEN * n_pad),
        transcendentals=0,
        bytes_accessed=(padded_batch * in_dim * 2        # x (bf16)
                        + padded_batch * n_pad * 4       # out (f32)
                        + weight_bytes
                        + (2 * HIDDEN + n_pad) * 4))     # biases (f32)

    out = pl.pallas_call(
        _make_dqn_kernel(act_dtype),
        out_shape=jax.ShapeDtypeStruct((padded_batch, n_pad), jnp.float32),
        grid=grid,
        in_specs=[
            pl.BlockSpec((tb, in_dim), lambda i: (i, 0)),         # x tile
            pl.BlockSpec((in_dim, HIDDEN), lambda i: (0, 0)),     # w1 (resident)
            pl.BlockSpec((1, HIDDEN), lambda i: (0, 0)),          # b1
            pl.BlockSpec((HIDDEN, HIDDEN), lambda i: (0, 0)),     # w2
            pl.BlockSpec((1, HIDDEN), lambda i: (0, 0)),          # b2
            pl.BlockSpec((HIDDEN, n_pad), lambda i: (0, 0)),      # w3
            pl.BlockSpec((1, n_pad), lambda i: (0, 0)),           # b3
        ],
        out_specs=pl.BlockSpec((tb, n_pad), lambda i: (i, 0)),
        compiler_params=pltpu.CompilerParams(
            dimension_semantics=("parallel",)),
        cost_estimate=cost,
    )(xb, w1, b1, w2, b2, w3, b3)

    # Fused inside the jit -> no extra HBM round trip for the slice.
    return out[:batch, :output_dim]


def init_params(key, input_dim, output_dim, hidden=HIDDEN):
    """f32 params mimicking PyTorch nn.Linear default init, stored transposed."""
    def linear(k, fan_in, fan_out):
        kw, kb = jax.random.split(k)
        bound = 1.0 / jnp.sqrt(float(fan_in))
        w = jax.random.uniform(kw, (fan_in, fan_out), jnp.float32, -bound, bound)
        b = jax.random.uniform(kb, (1, fan_out), jnp.float32, -bound, bound)
        return w, b

    k1, k2, k3 = jax.random.split(key, 3)
    w1, b1 = linear(k1, input_dim, hidden)
    w2, b2 = linear(k2, hidden, hidden)
    w3, b3 = linear(k3, hidden, output_dim)
    return (w1, b1, w2, b2, w3, b3)


def prepare_kernel_params(params):
    """Pad fc3 output to a lane-dense 128 columns, cast weights to bf16 (one-time)."""
    w1, b1, w2, b2, w3, b3 = params
    out_dim = w3.shape[1]
    n_pad = _round_up(out_dim, LANE)

    w3p = jnp.zeros((w3.shape[0], n_pad), jnp.float32).at[:, :out_dim].set(w3)
    b3p = jnp.zeros((1, n_pad), jnp.float32).at[:, :out_dim].set(b3)

    return (w1.astype(jnp.bfloat16), b1,
            w2.astype(jnp.bfloat16), b2,
            w3p.astype(jnp.bfloat16), b3p)


def reference_forward(x, kparams, *, output_dim, act_dtype=jnp.float32):
    """Pure-JAX reference at matching precision (bf16 matmul, f32 accumulate)."""
    w1, b1, w2, b2, w3, b3 = kparams
    xb = x.astype(jnp.bfloat16)
    h1 = jnp.dot(xb, w1, preferred_element_type=jnp.float32).astype(act_dtype)
    h1 = jnp.maximum(h1 + b1.astype(act_dtype), 0.0)
    h2 = jnp.dot(h1.astype(jnp.bfloat16), w2,
                 preferred_element_type=jnp.float32).astype(act_dtype)
    h2 = jnp.maximum(h2 + b2.astype(act_dtype), 0.0)
    o = jnp.dot(h2.astype(jnp.bfloat16), w3,
                preferred_element_type=jnp.float32) + b3
    return o[:, :output_dim]


if __name__ == "__main__":
    key = jax.random.PRNGKey(0)
    k_x, k_x2, k_p = jax.random.split(key, 3)

    input_dim, output_dim = 32, 8
    params = init_params(k_p, input_dim, output_dim)
    kparams = prepare_kernel_params(params)

    use_bf16 = _default_bf16_activations()
    act_dtype = jnp.bfloat16 if use_bf16 else jnp.float32
    tol = 2e-2 if use_bf16 else 2e-3

    # Batched states (2 parallel grid steps) — the overhead-amortized path.
    batch = 512
    x = jax.random.normal(k_x, (batch, input_dim), jnp.float32)
    out = jax.block_until_ready(
        dqn_forward(x, kparams, output_dim=output_dim,
                    bf16_activations=use_bf16))
    ref = reference_forward(x, kparams, output_dim=output_dim,
                            act_dtype=act_dtype)
    assert out.shape == (batch, output_dim)
    assert jnp.allclose(out, ref, atol=tol, rtol=tol), \
        "mismatch vs reference (batched)"

    # Small ragged batch exercises the fused row-padding path (action selection).
    x_small = jax.random.normal(k_x2, (3, input_dim), jnp.float32)
    out_small = jax.block_until_ready(
        dqn_forward(x_small, kparams, output_dim=output_dim,
                    bf16_activations=use_bf16))
    ref_small = reference_forward(x_small, kparams, output_dim=output_dim,
                                  act_dtype=act_dtype)
    assert out_small.shape == (3, output_dim)
    assert jnp.allclose(out_small, ref_small, atol=tol, rtol=tol), \
        "mismatch vs reference (small batch)"

    print("KERNEL_OK")
</pallas_src>

<mosaic_0001>
module attributes {stable_mosaic.version = 11 : i64} {
  func.func @kernel(%arg0: i32, %arg1: memref<256x32xbf16, #tpu.memory_space<vmem>>, %arg2: memref<32x128xbf16, #tpu.memory_space<vmem>>, %arg3: memref<1x128xf32, #tpu.memory_space<vmem>>, %arg4: memref<128x128xbf16, #tpu.memory_space<vmem>>, %arg5: memref<1x128xf32, #tpu.memory_space<vmem>>, %arg6: memref<128x128xbf16, #tpu.memory_space<vmem>>, %arg7: memref<1x128xf32, #tpu.memory_space<vmem>>, %arg8: memref<256x128xf32, #tpu.memory_space<vmem>>) attributes {dimension_semantics = [#tpu.dimension_semantics<parallel>], iteration_bounds = array<i64: 2>, scalar_prefetch = 0 : i64, scratch_operands = 0 : i64, tpu.core_type = #tpu.core_type<tc>, window_params = [{transform_indices = @transform_0, window_bounds = array<i64: 256, 32>}, {pipeline_mode = #tpu.pipeline_mode<synchronous>, transform_indices = @transform_1, window_bounds = array<i64: 32, 128>}, {pipeline_mode = #tpu.pipeline_mode<synchronous>, transform_indices = @transform_2, window_bounds = array<i64: 1, 128>}, {pipeline_mode = #tpu.pipeline_mode<synchronous>, transform_indices = @transform_3, window_bounds = array<i64: 128, 128>}, {pipeline_mode = #tpu.pipeline_mode<synchronous>, transform_indices = @transform_4, window_bounds = array<i64: 1, 128>}, {pipeline_mode = #tpu.pipeline_mode<synchronous>, transform_indices = @transform_5, window_bounds = array<i64: 128, 128>}, {pipeline_mode = #tpu.pipeline_mode<synchronous>, transform_indices = @transform_6, window_bounds = array<i64: 1, 128>}, {transform_indices = @transform_7, window_bounds = array<i64: 256, 128>}]} {
    %c0 = arith.constant 0 : index
    %c0_0 = arith.constant 0 : index
    %0 = vector.load %arg1[%c0, %c0_0] : memref<256x32xbf16, #tpu.memory_space<vmem>>, vector<256x32xbf16>
    %c0_1 = arith.constant 0 : index
    %c0_2 = arith.constant 0 : index
    %1 = vector.load %arg2[%c0_1, %c0_2] : memref<32x128xbf16, #tpu.memory_space<vmem>>, vector<32x128xbf16>
    %cst = arith.constant dense<0.000000e+00> : vector<256x128xf32>
    %2 = tpu.matmul %0, %1, %cst {dimension_numbers = #tpu.dot_dimension_numbers<[1], [0], [0], [1], [0, 0, 1, 1], [], []>} : vector<256x32xbf16>, vector<32x128xbf16>, vector<256x128xf32> -> vector<256x128xf32>
    %3 = arith.truncf %2 : vector<256x128xf32> to vector<256x128xbf16>
    %c0_3 = arith.constant 0 : index
    %c0_4 = arith.constant 0 : index
    %4 = vector.load %arg3[%c0_3, %c0_4] : memref<1x128xf32, #tpu.memory_space<vmem>>, vector<1x128xf32>
    %5 = arith.truncf %4 : vector<1x128xf32> to vector<1x128xbf16>
    %6 = vector.broadcast %5 : vector<1x128xbf16> to vector<256x128xbf16>
    %7 = arith.addf %3, %6 : vector<256x128xbf16>
    %cst_5 = arith.constant 0.000000e+00 : bf16
    %8 = vector.broadcast %cst_5 : bf16 to vector<256x128xbf16>
    %9 = arith.maximumf %7, %8 : vector<256x128xbf16>
    %c0_6 = arith.constant 0 : index
    %c0_7 = arith.constant 0 : index
    %10 = vector.load %arg4[%c0_6, %c0_7] : memref<128x128xbf16, #tpu.memory_space<vmem>>, vector<128x128xbf16>
    %cst_8 = arith.constant dense<0.000000e+00> : vector<256x128xf32>
    %11 = tpu.matmul %9, %10, %cst_8 {dimension_numbers = #tpu.dot_dimension_numbers<[1], [0], [0], [1], [0, 0, 1, 1], [], []>} : vector<256x128xbf16>, vector<128x128xbf16>, vector<256x128xf32> -> vector<256x128xf32>
    %12 = arith.truncf %11 : vector<256x128xf32> to vector<256x128xbf16>
    %c0_9 = arith.constant 0 : index
    %c0_10 = arith.constant 0 : index
    %13 = vector.load %arg5[%c0_9, %c0_10] : memref<1x128xf32, #tpu.memory_space<vmem>>, vector<1x128xf32>
    %14 = arith.truncf %13 : vector<1x128xf32> to vector<1x128xbf16>
    %15 = vector.broadcast %14 : vector<1x128xbf16> to vector<256x128xbf16>
    %16 = arith.addf %12, %15 : vector<256x128xbf16>
    %cst_11 = arith.constant 0.000000e+00 : bf16
    %17 = vector.broadcast %cst_11 : bf16 to vector<256x128xbf16>
    %18 = arith.maximumf %16, %17 : vector<256x128xbf16>
    %c0_12 = arith.constant 0 : index
    %c0_13 = arith.constant 0 : index
    %19 = vector.load %arg6[%c0_12, %c0_13] : memref<128x128xbf16, #tpu.memory_space<vmem>>, vector<128x128xbf16>
    %cst_14 = arith.constant dense<0.000000e+00> : vector<256x128xf32>
    %20 = tpu.matmul %18, %19, %cst_14 {dimension_numbers = #tpu.dot_dimension_numbers<[1], [0], [0], [1], [0, 0, 1, 1], [], []>} : vector<256x128xbf16>, vector<128x128xbf16>, vector<256x128xf32> -> vector<256x128xf32>
    %c0_15 = arith.constant 0 : index
    %c0_16 = arith.constant 0 : index
    %21 = vector.load %arg7[%c0_15, %c0_16] : memref<1x128xf32, #tpu.memory_space<vmem>>, vector<1x128xf32>
    %22 = vector.broadcast %21 : vector<1x128xf32> to vector<256x128xf32>
    %23 = arith.addf %20, %22 : vector<256x128xf32>
    %c0_17 = arith.constant 0 : index
    %c0_18 = arith.constant 0 : index
    %24 = vector.load %arg8[%c0_17, %c0_18] : memref<256x128xf32, #tpu.memory_space<vmem>>, vector<256x128xf32>
    tpu.vector_store %arg8[%c0_17, %c0_18], %23 {strides = array<i32>} : memref<256x128xf32, #tpu.memory_space<vmem>>, vector<256x128xf32>,
    return
  }
  func.func @transform_0(%arg0: i32) -> (i32, i32) {
    %c0_i32 = arith.constant 0 : i32
    %c0_i32_0 = arith.constant 0 : i32
    return %arg0, %c0_i32 : i32, i32
  }
  func.func @transform_1(%arg0: i32) -> (i32, i32) {
    %c0_i32 = arith.constant 0 : i32
    %c0_i32_0 = arith.constant 0 : i32
    %c0_i32_1 = arith.constant 0 : i32
    return %c0_i32, %c0_i32_0 : i32, i32
  }
  func.func @transform_2(%arg0: i32) -> (i32, i32) {
    %c0_i32 = arith.constant 0 : i32
    %c0_i32_0 = arith.constant 0 : i32
    %c0_i32_1 = arith.constant 0 : i32
    return %c0_i32, %c0_i32_0 : i32, i32
  }
  func.func @transform_3(%arg0: i32) -> (i32, i32) {
    %c0_i32 = arith.constant 0 : i32
    %c0_i32_0 = arith.constant 0 : i32
    %c0_i32_1 = arith.constant 0 : i32
    return %c0_i32, %c0_i32_0 : i32, i32
  }
  func.func @transform_4(%arg0: i32) -> (i32, i32) {
    %c0_i32 = arith.constant 0 : i32
    %c0_i32_0 = arith.constant 0 : i32
    %c0_i32_1 = arith.constant 0 : i32
    return %c0_i32, %c0_i32_0 : i32, i32
  }
  func.func @transform_5(%arg0: i32) -> (i32, i32) {
    %c0_i32 = arith.constant 0 : i32
    %c0_i32_0 = arith.constant 0 : i32
    %c0_i32_1 = arith.constant 0 : i32
    return %c0_i32, %c0_i32_0 : i32, i32
  }
  func.func @transform_6(%arg0: i32) -> (i32, i32) {
    %c0_i32 = arith.constant 0 : i32
    %c0_i32_0 = arith.constant 0 : i32
    %c0_i32_1 = arith.constant 0 : i32
    return %c0_i32, %c0_i32_0 : i32, i32
  }
  func.func @transform_7(%arg0: i32) -> (i32, i32) {
    %c0_i32 = arith.constant 0 : i32
    %c0_i32_0 = arith.constant 0 : i32
    return %arg0, %c0_i32 : i32, i32
  }
}

</mosaic_0001>

<bundles_post_ra>
// kernel: dqn_forward.1
= control target key start
LH: loop header
LB: loop body
LE: loop exit
PB: predicated region body
PF: predicated region fallthrough
CT: control target
= control target key end

     0   :  { %s1636_s24 = smov 0   ;;  %s1897_s0 = inlined_call_operand.vmem [shape: bf16[512,32], index: 0, kind: input, shape index: {}]   ;;  %s1898_s1 = inlined_call_operand.vmem [shape: bf16[32,128], index: 1, kind: input, shape index: {}]   ;;  %s1899_s2 = inlined_call_operand.vmem [shape: f32[1,128], index: 2, kind: input, shape index: {}]   ;;  %s1900_s3 = inlined_call_operand.vmem [shape: bf16[128,128], index: 3, kind: input, shape index: {}]   ;;  %s1901_s4 = inlined_call_operand.vmem [shape: f32[1,128], index: 4, kind: input, shape index: {}]   ;;  %s1902_s5 = inlined_call_operand.vmem [shape: bf16[128,128], index: 5, kind: input, shape index: {}]   ;;  %s1903_s6 = inlined_call_operand.vmem [shape: f32[1,128], index: 6, kind: input, shape index: {}]   ;;  %s1904_s7 = inlined_call_operand.vmem [shape: f32[512,128], index: 7, kind: output, shape index: {}]  }
   0x1 LB: > { %s1280_s25 = sadd.s32 4294967295, %s1593_s24   ;;  %p1284_p0 = scmp.ge.s32.totalorder %s1593_s24, 1  ;;  %s1593_s24 = sphi %s1636_s24, %s17_s24  }
   0x2   : > { %p238_p1 = scmp.lt.s32.totalorder %s1593_s24, 3 }
   0x4   : > { %p239_p2 = pnand %p1284_p0, %p238_p1 }
   0x5   : > { %s1285_s28 = sshll.u32 (!%p239_p2), %s1280_s25, 5 }
   0x6   : > { %242 = sbr.rel (%p239_p2) target bundleno = 690 (0x2b2), region = 48  ;;  %p271_p3 = scmp.lt.s32.totalorder (!%p239_p2), %s1285_s28, 63 }
   0xb   : > { %v1553_v0 = vld [vmem:[%s1898_s1 + $0x8] sm:$0xff]   ;;  %v1554_v1 = vld [vmem:[%s1898_s1] sm:$0xff]   ;;  %s1906_s28 = smov (!%p271_p3, %s1285_s28), 63  ;;  %v1571_v2 = vld [vmem:[%s1900_s3 + $0x38] sm:$0xff]   ;;  %vm411_vm0 = vcmask 261120   ;;  %v642_v31 = vlaneseq  ;;  %v1595_v50 = vmov 0  }
   0xc   : > { %1408 = vmatprep.subr.bf16.mxu0 %v1553_v0  ;;  %1540 = vmatprep.subr.bf16.mxu1 %v1553_v0  ;;  %s1286_s10 = sshll.u32 %s1906_s28, 2  ;;  %v1572_v9 = vld [vmem:[%s1900_s3 + $0x30] sm:$0xff]   ;;  %v1573_v12 = vld [vmem:[%s1900_s3 + $0x28] sm:$0xff]   ;;  %v1574_v17 = vld [vmem:[%s1900_s3 + $0x20] sm:$0xff]   ;;  %s1288_s29 = sshll.u32 %s1906_s28, 3 }
   0xd   : > { %1409 = vmatpush3.bf16.msra.mxu0 %v1553_v0  ;;  %1542 = vmatpush3.bf16.msra.mxu1 %v1553_v0  ;;  %s1659_s13 = scalar_lea.vmem %s1897_s0, %s1286_s10  ;;  %v1575_v18 = vld [vmem:[%s1900_s3 + $0x18] sm:$0xff]   ;;  %v1576_v23 = vld [vmem:[%s1900_s3 + $0x10] sm:$0xff]   ;;  %v1577_v24 = vld [vmem:[%s1900_s3 + $0x8] sm:$0xff]   ;;  %v1732_v34 = vshrl.u32 %v642_v31, 7  ;;  %s1828_s11 = scalar_lea.vmem %s1904_s7, %s1288_s29 }
   0xe   : > { %1410 = vmatprep.subr.bf16.mxu0 %v1554_v1  ;;  %1541 = vmatprep.subr.bf16.mxu1 %v1554_v1  ;;  %v1555_v3 = vld [vmem:[%s1659_s13] sm:$0xff]   ;;  %v1556_v4 = vld [vmem:[%s1659_s13 + $0x8] sm:$0xff]   ;;  %v1557_v5 = vld [vmem:[%s1659_s13 + $0x10] sm:$0xff]  }
   0xf   : > { %1412 = vmatprep.mubr.msk.bf16.mxu0 %vm411_vm0, %v1555_v3  ;;  %v1558_v6 = vld [vmem:[%s1659_s13 + $0x18] sm:$0xff]   ;;  %v1559_v7 = vld [vmem:[%s1659_s13 + $0x20] sm:$0xff]   ;;  %v1564_v10 = vld [vmem:[%s1659_s13 + $0x48] sm:$0xff]   ;;  %v644_v37 = vsub.s32 0, %v1732_v34 }
  0x10   : > { %v1563_v8 = vld [vmem:[%s1659_s13 + $0x40] sm:$0xff]   ;;  %v1565_v11 = vld [vmem:[%s1659_s13 + $0x50] sm:$0xff]   ;;  %v1560_v13 = vld [vmem:[%s1659_s13 + $0x28] sm:$0xff]  }
  0x11   : > { %1411 = vmatpush3.bf16.msra.mxu0 %v1554_v1  ;;  %1543 = vmatpush3.bf16.msra.mxu1 %v1554_v1  ;;  %v1561_v14 = vld [vmem:[%s1659_s13 + $0x30] sm:$0xff]   ;;  %v1566_v15 = vld [vmem:[%s1659_s13 + $0x58] sm:$0xff]   ;;  %v1567_v16 = vld [vmem:[%s1659_s13 + $0x60] sm:$0xff]  }
  0x12   : > { %1444 = vmatprep.subr.bf16.mxu1 %v1571_v2  ;;  %1428 = vmatprep.mubr.msk.bf16.mxu1 %vm411_vm0, %v1563_v8  ;;  %v1562_v19 = vld [vmem:[%s1659_s13 + $0x38] sm:$0xff]   ;;  %v1568_v20 = vld [vmem:[%s1659_s13 + $0x68] sm:$0xff]   ;;  %v1569_v21 = vld [vmem:[%s1659_s13 + $0x70] sm:$0xff]  }
  0x13   : > { %v1570_v22 = vld [vmem:[%s1659_s13 + $0x78] sm:$0xff]   ;;  %v1578_v25 = vld [vmem:[%s1900_s3] sm:$0xff]   ;;  %v1580_v27 = vld [vmem:[%s1902_s5 + $0x30] sm:$0xff]  }
  0x14   : > { %1413 = vmatmul.mubr.msk.bf16.vlgmr.msra.gmra.mxu0 %vm411_vm0, %v1556_v4  ;;  %1429 = vmatmul.mubr.msk.bf16.vlgmr.msra.gmra.mxu1 %vm411_vm0, %v1564_v10  ;;  %v1579_v26 = vld [vmem:[%s1902_s5 + $0x38] sm:$0xff]   ;;  %v1581_v28 = vld [vmem:[%s1902_s5 + $0x28] sm:$0xff]   ;;  %v1582_v29 = vld [vmem:[%s1902_s5 + $0x20] sm:$0xff]  }
  0x15   : > { %1416 = vmatprep.mubr.msk.bf16.mxu0 %vm411_vm0, %v1557_v5  ;;  %1432 = vmatprep.mubr.msk.bf16.mxu1 %vm411_vm0, %v1565_v11  ;;  %v1583_v30 = vld [vmem:[%s1902_s5 + $0x18] sm:$0xff]   ;;  %v637_v32 = vld [vmem:[%s1899_s2] sm:$0x1] }
  0x16   : > { %1445 = vmatpush3.bf16.msra.mxu1 %v1571_v2  ;;  %1492 = vmatprep.subr.bf16.mxu0 %v1579_v26  ;;  %v638_v33 = vpack.c.bf16 %v637_v32, %v637_v32 }
  0x17   : > { %1446 = vmatprep.subr.bf16.mxu1 %v1572_v9  ;;  %1493 = vmatpush3.bf16.msra.mxu0 %v1579_v26 }
  0x18   : > { %1494 = vmatprep.subr.bf16.mxu0 %v1580_v27  ;;  %v640_v36 = vpack.i.b16 %v638_v33, %v638_v33 }
  0x1a   : > { %1447 = vmatpush3.bf16.msra.mxu1 %v1572_v9  ;;  %v1737_v40 = vrot.slane %v640_v36, %v644_v37 }
  0x1b   : > { %1448 = vmatprep.subr.bf16.mxu1 %v1573_v12  ;;  %1495 = vmatpush3.bf16.msra.mxu0 %v1580_v27 }
  0x1c   : > { %1417 = vmatmul.mubr.msk.bf16.gmra.mxu0 %vm411_vm0, %v1558_v6  ;;  %1433 = vmatmul.mubr.msk.bf16.gmra.mxu1 %vm411_vm0, %v1566_v15 }
  0x1d   : > { %1420 = vmatprep.mubr.msk.bf16.mxu0 %vm411_vm0, %v1559_v7  ;;  %1436 = vmatprep.mubr.msk.bf16.mxu1 %vm411_vm0, %v1567_v16 }
  0x1e   : > { %1449 = vmatpush3.bf16.msra.mxu1 %v1573_v12  ;;  %1496 = vmatprep.subr.bf16.mxu0 %v1581_v28 }
  0x1f   : > { %1450 = vmatprep.subr.bf16.mxu1 %v1574_v17  ;;  %1497 = vmatpush3.bf16.msra.mxu0 %v1581_v28 }
  0x20   : > { %1498 = vmatprep.subr.bf16.mxu0 %v1582_v29 }
  0x22   : > { %1451 = vmatpush3.bf16.msra.mxu1 %v1574_v17 }
  0x23   : > { %1452 = vmatprep.subr.bf16.mxu1 %v1575_v18  ;;  %1499 = vmatpush3.bf16.msra.mxu0 %v1582_v29 }
  0x24   : > { %1421 = vmatmul.mubr.msk.bf16.gmra.mxu0 %vm411_vm0, %v1560_v13  ;;  %1437 = vmatmul.mubr.msk.bf16.gmra.mxu1 %vm411_vm0, %v1568_v20 }
  0x25   : > { %1424 = vmatprep.mubr.msk.bf16.mxu0 %vm411_vm0, %v1561_v14  ;;  %1440 = vmatprep.mubr.msk.bf16.mxu1 %vm411_vm0, %v1569_v21 }
  0x26   : > { %1453 = vmatpush3.bf16.msra.mxu1 %v1575_v18  ;;  %1500 = vmatprep.subr.bf16.mxu0 %v1583_v30 }
  0x27   : > { %1454 = vmatprep.subr.bf16.mxu1 %v1576_v23  ;;  %1501 = vmatpush3.bf16.msra.mxu0 %v1583_v30 }
  0x2a   : > { %1455 = vmatpush3.bf16.msra.mxu1 %v1576_v23 }
  0x2b   : > { %1456 = vmatprep.subr.bf16.mxu1 %v1577_v24 }
  0x2c   : > { %1425 = vmatmul.mubr.msk.bf16.gmra.mxu0 %vm411_vm0, %v1562_v19  ;;  %1441 = vmatmul.mubr.msk.bf16.gmra.mxu1 %vm411_vm0, %v1570_v22 }
  0x2e   : > { %1457 = vmatpush3.bf16.msra.mxu1 %v1577_v24 }
  0x2f   : > { %1458 = vmatprep.subr.bf16.mxu1 %v1578_v25 }
  0x32   : > { %1459 = vmatpush3.bf16.msra.mxu1 %v1578_v25 }
  0xd4   : > { %v1414_v35 = vpop.f32.mrf.mxu0  ;;  %v1430_v46 = vpop.f32.mrf.mxu1 }
  0xd6   : > { %v494_v38 = vpop.f32.mrf.mxu0  ;;  %v558_v49 = vpop.f32.mrf.mxu1 }
  0xd8   : > { %v1415_v39 = vpop.f32.mrf.mxu0  ;;  %v1431_v54 = vpop.f32.mrf.mxu1 }
  0xd9   : > { %v622_v41 = vpack.c.bf16 %v1415_v39, %v1414_v35  ;;  %v630_v30 = vpack.c.bf16 %v1431_v54, %v1430_v46 }
  0xda   : > { %v497_v42 = vpop.f32.mrf.mxu0  ;;  %v561_v57 = vpop.f32.mrf.mxu1 }
  0xdb   : > { %v621_v43 = vpack.c.bf16 %v497_v42, %v494_v38  ;;  %v647_v44 = vadd.bf16 %v1737_v40, %v622_v41  ;;  %v629_v16 = vpack.c.bf16 %v561_v57, %v558_v49  ;;  %v655_v35 = vadd.bf16 %v1737_v40, %v630_v30 }
  0xdc   : > { %v1418_v45 = vpop.f32.mrf.mxu0  ;;  %v1434_v61 = vpop.f32.mrf.mxu1 }
  0xdd   : > { %v646_v47 = vadd.bf16 %v1737_v40, %v621_v43  ;;  %v663_v52 = vmax.bf16 %v1595_v50, %v647_v44  ;;  %v654_v23 = vadd.bf16 %v1737_v40, %v629_v16  ;;  %v671_v42 = vmax.bf16 %v1595_v50, %v655_v35 }
  0xde   : > { %v510_v48 = vpop.f32.mrf.mxu0  ;;  %v574_v0 = vpop.f32.mrf.mxu1 }
  0xdf   : > { %v662_v51 = vmax.bf16 %v1595_v50, %v646_v47  ;;  %v670_v28 = vmax.bf16 %v1595_v50, %v654_v23 }
  0xe0   : > { %v1419_v53 = vpop.f32.mrf.mxu0  ;;  %v1435_v4 = vpop.f32.mrf.mxu1 }
  0xe1   : > { %v624_v55 = vpack.c.bf16 %v1419_v53, %v1418_v45  ;;  %1460 = vmatprep.mubr.bf16.mxu1 %v662_v51  ;;  %v632_v41 = vpack.c.bf16 %v1435_v4, %v1434_v61  ;;  %v1586_v61 = vld [vmem:[%s1902_s5] sm:$0xff]  }
  0xe2   : > { %v513_v56 = vpop.f32.mrf.mxu0  ;;  %1461 = vmatmul.mubr.bf16.vlgmr.msra.gmra.mxu1 %v663_v52  ;;  %v577_v7 = vpop.f32.mrf.mxu1 }
  0xe3   : > { %v623_v58 = vpack.c.bf16 %v513_v56, %v510_v48  ;;  %v649_v59 = vadd.bf16 %v1737_v40, %v624_v55  ;;  %v631_v29 = vpack.c.bf16 %v577_v7, %v574_v0  ;;  %v657_v45 = vadd.bf16 %v1737_v40, %v632_v41 }
  0xe4   : > { %v1422_v60 = vpop.f32.mrf.mxu0  ;;  %v1438_v11 = vpop.f32.mrf.mxu1 }
  0xe5   : > { %v648_v62 = vadd.bf16 %v1737_v40, %v623_v58  ;;  %v665_v3 = vmax.bf16 %v1595_v50, %v649_v59  ;;  %v656_v33 = vadd.bf16 %v1737_v40, %v631_v29  ;;  %v673_v51 = vmax.bf16 %v1595_v50, %v657_v45  ;;  %v1584_v59 = vld [vmem:[%s1902_s5 + $0x10] sm:$0xff]  }
  0xe6   : > { %v526_v63 = vpop.f32.mrf.mxu0  ;;  %v590_v14 = vpop.f32.mrf.mxu1  ;;  %1502 = vmatprep.subr.bf16.mxu0 %v1584_v59 }
  0xe7   : > { %v664_v1 = vmax.bf16 %v1595_v50, %v648_v62  ;;  %v672_v38 = vmax.bf16 %v1595_v50, %v656_v33  ;;  %1503 = vmatpush3.bf16.msra.mxu0 %v1584_v59 }
  0xe8   : > { %v1423_v2 = vpop.f32.mrf.mxu0  ;;  %v1439_v19 = vpop.f32.mrf.mxu1 }
  0xe9   : > { %v626_v5 = vpack.c.bf16 %v1423_v2, %v1422_v60  ;;  %1464 = vmatprep.mubr.bf16.mxu1 %v664_v1  ;;  %v634_v49 = vpack.c.bf16 %v1439_v19, %v1438_v11  ;;  %v1585_v60 = vld [vmem:[%s1902_s5 + $0x8] sm:$0xff]  }
  0xea   : > { %v529_v6 = vpop.f32.mrf.mxu0  ;;  %1465 = vmatmul.mubr.bf16.gmra.mxu1 %v665_v3  ;;  %v593_v25 = vpop.f32.mrf.mxu1  ;;  %1504 = vmatprep.subr.bf16.mxu0 %v1585_v60 }
  0xeb   : > { %v625_v8 = vpack.c.bf16 %v529_v6, %v526_v63  ;;  %v651_v9 = vadd.bf16 %v1737_v40, %v626_v5  ;;  %v633_v39 = vpack.c.bf16 %v593_v25, %v590_v14  ;;  %v659_v53 = vadd.bf16 %v1737_v40, %v634_v49  ;;  %1505 = vmatpush3.bf16.msra.mxu0 %v1585_v60 }
  0xec   : > { %v1426_v10 = vpop.f32.mrf.mxu0  ;;  %v1442_v32 = vpop.f32.mrf.mxu1  ;;  %1506 = vmatprep.subr.bf16.mxu0 %v1586_v61 }
  0xed   : > { %v650_v12 = vadd.bf16 %v1737_v40, %v625_v8  ;;  %v667_v18 = vmax.bf16 %v1595_v50, %v651_v9  ;;  %v658_v44 = vadd.bf16 %v1737_v40, %v633_v39  ;;  %v675_v56 = vmax.bf16 %v1595_v50, %v659_v53 }
  0xee   : > { %v542_v13 = vpop.f32.mrf.mxu0  ;;  %v606_v36 = vpop.f32.mrf.mxu1 }
  0xef   : > { %v666_v15 = vmax.bf16 %v1595_v50, %v650_v12  ;;  %v674_v47 = vmax.bf16 %v1595_v50, %v658_v44  ;;  %1507 = vmatpush3.bf16.msra.mxu0 %v1586_v61 }
  0xf0   : > { %v1427_v17 = vpop.f32.mrf.mxu0  ;;  %v1443_v43 = vpop.f32.mrf.mxu1 }
  0xf1   : > { %v628_v20 = vpack.c.bf16 %v1427_v17, %v1426_v10  ;;  %1468 = vmatprep.mubr.bf16.mxu1 %v666_v15  ;;  %v636_v55 = vpack.c.bf16 %v1443_v43, %v1442_v32 }
  0xf2   : > { %v545_v21 = vpop.f32.mrf.mxu0  ;;  %1469 = vmatmul.mubr.bf16.gmra.mxu1 %v667_v18  ;;  %v609_v46 = vpop.f32.mrf.mxu1 }
  0xf3   : > { %v627_v22 = vpack.c.bf16 %v545_v21, %v542_v13  ;;  %v653_v24 = vadd.bf16 %v1737_v40, %v628_v20  ;;  %v635_v48 = vpack.c.bf16 %v609_v46, %v606_v36  ;;  %v661_v57 = vadd.bf16 %v1737_v40, %v636_v55 }
  0xf5   : > { %v652_v26 = vadd.bf16 %v1737_v40, %v627_v22  ;;  %v669_v31 = vmax.bf16 %v1595_v50, %v653_v24  ;;  %v660_v52 = vadd.bf16 %v1737_v40, %v635_v48  ;;  %v677_v58 = vmax.bf16 %v1595_v50, %v661_v57  ;;  %v919_v40 = vld [vmem:[%s1901_s4] sm:$0x1] }
  0xf6   : > { %v920_v62 = vpack.c.bf16 %v919_v40, %v919_v40 }
  0xf7   : > { %v668_v27 = vmax.bf16 %v1595_v50, %v652_v26  ;;  %v676_v54 = vmax.bf16 %v1595_v50, %v660_v52 }
  0xf8   : > { %v922_v0 = vpack.i.b16 %v920_v62, %v920_v62 }
  0xf9   : > { %1472 = vmatprep.mubr.bf16.mxu1 %v668_v27 }
  0xfa   : > { %1473 = vmatmul.mubr.bf16.gmra.mxu1 %v669_v31  ;;  %v1785_v3 = vrot.slane %v922_v0, %v644_v37 }
  0xfb   : > { %1476 = vmatprep.mubr.bf16.mxu1 %v670_v28 }
 0x102   : > { %1477 = vmatmul.mubr.bf16.gmra.mxu1 %v671_v42 }
 0x103   : > { %1480 = vmatprep.mubr.bf16.mxu1 %v672_v38 }
 0x10a   : > { %1481 = vmatmul.mubr.bf16.gmra.mxu1 %v673_v51 }
 0x10b   : > { %1484 = vmatprep.mubr.bf16.mxu1 %v674_v47 }
 0x112   : > { %1485 = vmatmul.mubr.bf16.gmra.mxu1 %v675_v56 }
 0x113   : > { %1488 = vmatprep.mubr.bf16.mxu1 %v676_v54 }
 0x11a   : > { %1489 = vmatmul.mubr.bf16.gmra.mxu1 %v677_v58 }
 0x1a2   : > { %v1462_v63 = vpop.f32.mrf.mxu1 }
 0x1a4   : > { %v776_v1 = vpop.f32.mrf.mxu1 }
 0x1a6   : > { %v1463_v2 = vpop.f32.mrf.mxu1 }
 0x1a7   : > { %v904_v4 = vpack.c.bf16 %v1463_v2, %v1462_v63 }
 0x1a8   : > { %v779_v5 = vpop.f32.mrf.mxu1 }
 0x1a9   : > { %v903_v6 = vpack.c.bf16 %v779_v5, %v776_v1  ;;  %v929_v7 = vadd.bf16 %v1785_v3, %v904_v4 }
 0x1aa   : > { %v1466_v8 = vpop.f32.mrf.mxu1 }
 0x1ab   : > { %v928_v9 = vadd.bf16 %v1785_v3, %v903_v6  ;;  %v945_v12 = vmax.bf16 %v1595_v50, %v929_v7 }
 0x1ac   : > { %v792_v10 = vpop.f32.mrf.mxu1 }
 0x1ad   : > { %v944_v11 = vmax.bf16 %v1595_v50, %v928_v9 }
 0x1ae   : > { %v1467_v13 = vpop.f32.mrf.mxu1 }
 0x1af   : > { %v906_v14 = vpack.c.bf16 %v1467_v13, %v1466_v8  ;;  %1508 = vmatprep.mubr.bf16.mxu0 %v944_v11 }
 0x1b0   : > { %v795_v15 = vpop.f32.mrf.mxu1  ;;  %1509 = vmatmul.mubr.bf16.vlgmr.msra.gmra.mxu0 %v945_v12 }
 0x1b1   : > { %v905_v34 = vpack.c.bf16 %v795_v15, %v792_v10  ;;  %v931_v37 = vadd.bf16 %v1785_v3, %v906_v14 }
 0x1b2   : > { %v1470_v16 = vpop.f32.mrf.mxu1 }
 0x1b3   : > { %v930_v17 = vadd.bf16 %v1785_v3, %v905_v34  ;;  %v947_v21 = vmax.bf16 %v1595_v50, %v931_v37 }
 0x1b4   : > { %v808_v18 = vpop.f32.mrf.mxu1 }
 0x1b5   : > { %v946_v19 = vmax.bf16 %v1595_v50, %v930_v17  ;;  %v1823_v17 = vld [vmem:[%s1903_s6] ss:$0 sm:$0xff] }
 0x1b6   : > { %v1471_v20 = vpop.f32.mrf.mxu1 }
 0x1b7   : > { %v908_v22 = vpack.c.bf16 %v1471_v20, %v1470_v16  ;;  %1512 = vmatprep.mubr.bf16.mxu0 %v946_v19 }
 0x1b8   : > { %v811_v23 = vpop.f32.mrf.mxu1  ;;  %1513 = vmatmul.mubr.bf16.gmra.mxu0 %v947_v21 }
 0x1b9   : > { %v907_v24 = vpack.c.bf16 %v811_v23, %v808_v18  ;;  %v933_v25 = vadd.bf16 %v1785_v3, %v908_v22 }
 0x1ba   : > { %v1474_v26 = vpop.f32.mrf.mxu1 }
 0x1bb   : > { %v932_v27 = vadd.bf16 %v1785_v3, %v907_v24  ;;  %v949_v31 = vmax.bf16 %v1595_v50, %v933_v25 }
 0x1bc   : > { %v824_v28 = vpop.f32.mrf.mxu1 }
 0x1bd   : > { %v948_v29 = vmax.bf16 %v1595_v50, %v932_v27 }
 0x1be   : > { %v1475_v30 = vpop.f32.mrf.mxu1 }
 0x1bf   : > { %v910_v32 = vpack.c.bf16 %v1475_v30, %v1474_v26  ;;  %1516 = vmatprep.mubr.bf16.mxu0 %v948_v29 }
 0x1c0   : > { %v827_v33 = vpop.f32.mrf.mxu1  ;;  %1517 = vmatmul.mubr.bf16.gmra.mxu0 %v949_v31 }
 0x1c1   : > { %v909_v35 = vpack.c.bf16 %v827_v33, %v824_v28  ;;  %v935_v36 = vadd.bf16 %v1785_v3, %v910_v32 }
 0x1c2   : > { %v1478_v38 = vpop.f32.mrf.mxu1 }
 0x1c3   : > { %v934_v39 = vadd.bf16 %v1785_v3, %v909_v35  ;;  %v951_v44 = vmax.bf16 %v1595_v50, %v935_v36 }
 0x1c4   : > { %v840_v41 = vpop.f32.mrf.mxu1 }
 0x1c5   : > { %v950_v42 = vmax.bf16 %v1595_v50, %v934_v39 }
 0x1c6   : > { %v1479_v43 = vpop.f32.mrf.mxu1 }
 0x1c7   : > { %v912_v45 = vpack.c.bf16 %v1479_v43, %v1478_v38  ;;  %1520 = vmatprep.mubr.bf16.mxu0 %v950_v42 }
 0x1c8   : > { %v843_v46 = vpop.f32.mrf.mxu1  ;;  %1521 = vmatmul.mubr.bf16.gmra.mxu0 %v951_v44 }
 0x1c9   : > { %v911_v47 = vpack.c.bf16 %v843_v46, %v840_v41  ;;  %v937_v48 = vadd.bf16 %v1785_v3, %v912_v45 }
 0x1ca   : > { %v1482_v49 = vpop.f32.mrf.mxu1 }
 0x1cb   : > { %v936_v51 = vadd.bf16 %v1785_v3, %v911_v47  ;;  %v953_v55 = vmax.bf16 %v1595_v50, %v937_v48 }
 0x1cc   : > { %v856_v52 = vpop.f32.mrf.mxu1 }
 0x1cd   : > { %v952_v53 = vmax.bf16 %v1595_v50, %v936_v51 }
 0x1ce   : > { %v1483_v54 = vpop.f32.mrf.mxu1 }
 0x1cf   : > { %v914_v56 = vpack.c.bf16 %v1483_v54, %v1482_v49  ;;  %1524 = vmatprep.mubr.bf16.mxu0 %v952_v53 }
 0x1d0   : > { %v859_v57 = vpop.f32.mrf.mxu1  ;;  %1525 = vmatmul.mubr.bf16.gmra.mxu0 %v953_v55 }
 0x1d1   : > { %v913_v58 = vpack.c.bf16 %v859_v57, %v856_v52  ;;  %v939_v59 = vadd.bf16 %v1785_v3, %v914_v56 }
 0x1d2   : > { %v1486_v60 = vpop.f32.mrf.mxu1 }
 0x1d3   : > { %v938_v61 = vadd.bf16 %v1785_v3, %v913_v58  ;;  %v955_v0 = vmax.bf16 %v1595_v50, %v939_v59 }
 0x1d4   : > { %v872_v40 = vpop.f32.mrf.mxu1 }
 0x1d5   : > { %v954_v62 = vmax.bf16 %v1595_v50, %v938_v61 }
 0x1d6   : > { %v1487_v63 = vpop.f32.mrf.mxu1 }
 0x1d7   : > { %v916_v1 = vpack.c.bf16 %v1487_v63, %v1486_v60  ;;  %1528 = vmatprep.mubr.bf16.mxu0 %v954_v62 }
 0x1d8   : > { %v875_v2 = vpop.f32.mrf.mxu1  ;;  %1529 = vmatmul.mubr.bf16.gmra.mxu0 %v955_v0 }
 0x1d9   : > { %v915_v4 = vpack.c.bf16 %v875_v2, %v872_v40  ;;  %v941_v5 = vadd.bf16 %v1785_v3, %v916_v1 }
 0x1da   : > { %v1490_v6 = vpop.f32.mrf.mxu1 }
 0x1db   : > { %v940_v7 = vadd.bf16 %v1785_v3, %v915_v4  ;;  %v957_v11 = vmax.bf16 %v1595_v50, %v941_v5 }
 0x1dc   : > { %v888_v8 = vpop.f32.mrf.mxu1 }
 0x1dd   : > { %v956_v9 = vmax.bf16 %v1595_v50, %v940_v7 }
 0x1de   : > { %v1491_v10 = vpop.f32.mrf.mxu1 }
 0x1df   : > { %v918_v12 = vpack.c.bf16 %v1491_v10, %v1490_v6  ;;  %1532 = vmatprep.mubr.bf16.mxu0 %v956_v9 }
 0x1e0   : > { %v891_v13 = vpop.f32.mrf.mxu1  ;;  %1533 = vmatmul.mubr.bf16.gmra.mxu0 %v957_v11 }
 0x1e1   : > { %v917_v14 = vpack.c.bf16 %v891_v13, %v888_v8  ;;  %v943_v15 = vadd.bf16 %v1785_v3, %v918_v12 }
 0x1e3   : > { %v942_v34 = vadd.bf16 %v1785_v3, %v917_v14  ;;  %v959_v16 = vmax.bf16 %v1595_v50, %v943_v15 }
 0x1e5   : > { %v958_v37 = vmax.bf16 %v1595_v50, %v942_v34 }
 0x1e7   : > { %1536 = vmatprep.mubr.bf16.mxu0 %v958_v37 }
 0x1e8   : > { %1537 = vmatmul.mubr.bf16.gmra.mxu0 %v959_v16 }
 0x270   : > { %v1510_v3 = vpop.f32.mrf.mxu0 }
 0x271   : > { %v1074_v50 = vadd.f32 %v1510_v3, %v1823_v17 }
 0x272   : > { %v1065_v18 = vpop.f32.mrf.mxu0 }
 0x273   : > { %1194 = vst [vmem:[%s1828_s11 + $0x10] sm:$0xff] %v1074_v50  ;;  %v1066_v19 = vadd.f32 %v1823_v17, %v1065_v18 }
 0x274   : > { %v1511_v20 = vpop.f32.mrf.mxu0 }
 0x275   : > { %1192 = vst [vmem:[%s1828_s11] sm:$0xff] %v1066_v19  ;;  %v1077_v21 = vadd.f32 %v1511_v20, %v1823_v17 }
 0x276   : > { %v1068_v22 = vpop.f32.mrf.mxu0 }
 0x277   : > { %1195 = vst [vmem:[%s1828_s11 + $0x18] sm:$0xff] %v1077_v21  ;;  %v1069_v23 = vadd.f32 %v1823_v17, %v1068_v22 }
 0x278   : > { %v1514_v24 = vpop.f32.mrf.mxu0 }
 0x279   : > { %1193 = vst [vmem:[%s1828_s11 + $0x8] sm:$0xff] %v1069_v23  ;;  %v1090_v25 = vadd.f32 %v1514_v24, %v1823_v17 }
 0x27a   : > { %v1081_v26 = vpop.f32.mrf.mxu0 }
 0x27b   : > { %1198 = vst [vmem:[%s1828_s11 + $0x30] sm:$0xff] %v1090_v25  ;;  %v1082_v27 = vadd.f32 %v1823_v17, %v1081_v26 }
 0x27c   : > { %v1515_v28 = vpop.f32.mrf.mxu0 }
 0x27d   : > { %1196 = vst [vmem:[%s1828_s11 + $0x20] sm:$0xff] %v1082_v27  ;;  %v1093_v29 = vadd.f32 %v1515_v28, %v1823_v17 }
 0x27e   : > { %v1084_v30 = vpop.f32.mrf.mxu0 }
 0x27f   : > { %1199 = vst [vmem:[%s1828_s11 + $0x38] sm:$0xff] %v1093_v29  ;;  %v1085_v31 = vadd.f32 %v1823_v17, %v1084_v30 }
 0x280   : > { %v1518_v32 = vpop.f32.mrf.mxu0 }
 0x281   : > { %1197 = vst [vmem:[%s1828_s11 + $0x28] sm:$0xff] %v1085_v31  ;;  %v1106_v33 = vadd.f32 %v1518_v32, %v1823_v17 }
 0x282   : > { %v1097_v35 = vpop.f32.mrf.mxu0 }
 0x283   : > { %1202 = vst [vmem:[%s1828_s11 + $0x50] sm:$0xff] %v1106_v33  ;;  %v1098_v36 = vadd.f32 %v1823_v17, %v1097_v35 }
 0x284   : > { %v1519_v38 = vpop.f32.mrf.mxu0 }
 0x285   : > { %1200 = vst [vmem:[%s1828_s11 + $0x40] sm:$0xff] %v1098_v36  ;;  %v1109_v39 = vadd.f32 %v1519_v38, %v1823_v17 }
 0x286   : > { %v1100_v41 = vpop.f32.mrf.mxu0 }
 0x287   : > { %1203 = vst [vmem:[%s1828_s11 + $0x58] sm:$0xff] %v1109_v39  ;;  %v1101_v42 = vadd.f32 %v1823_v17, %v1100_v41 }
 0x288   : > { %v1522_v43 = vpop.f32.mrf.mxu0 }
 0x289   : > { %1201 = vst [vmem:[%s1828_s11 + $0x48] sm:$0xff] %v1101_v42  ;;  %v1122_v44 = vadd.f32 %v1522_v43, %v1823_v17 }
 0x28a   : > { %v1113_v45 = vpop.f32.mrf.mxu0 }
 0x28b   : > { %1206 = vst [vmem:[%s1828_s11 + $0x70] sm:$0xff] %v1122_v44  ;;  %v1114_v46 = vadd.f32 %v1823_v17, %v1113_v45 }
 0x28c   : > { %v1523_v47 = vpop.f32.mrf.mxu0 }
 0x28d   : > { %1204 = vst [vmem:[%s1828_s11 + $0x60] sm:$0xff] %v1114_v46  ;;  %v1125_v48 = vadd.f32 %v1523_v47, %v1823_v17 }
 0x28e   : > { %v1116_v49 = vpop.f32.mrf.mxu0 }
 0x28f   : > { %1207 = vst [vmem:[%s1828_s11 + $0x78] sm:$0xff] %v1125_v48  ;;  %v1117_v51 = vadd.f32 %v1823_v17, %v1116_v49 }
 0x290   : > { %v1526_v52 = vpop.f32.mrf.mxu0 }
 0x291   : > { %1205 = vst [vmem:[%s1828_s11 + $0x68] sm:$0xff] %v1117_v51  ;;  %v1138_v53 = vadd.f32 %v1526_v52, %v1823_v17 }
 0x292   : > { %v1129_v54 = vpop.f32.mrf.mxu0 }
 0x293   : > { %1210 = vst [vmem:[%s1828_s11 + $0x90] sm:$0xff] %v1138_v53  ;;  %v1130_v55 = vadd.f32 %v1823_v17, %v1129_v54 }
 0x294   : > { %v1527_v56 = vpop.f32.mrf.mxu0 }
 0x295   : > { %1208 = vst [vmem:[%s1828_s11 + $0x80] sm:$0xff] %v1130_v55  ;;  %v1141_v57 = vadd.f32 %v1527_v56, %v1823_v17 }
 0x296   : > { %v1132_v58 = vpop.f32.mrf.mxu0 }
 0x297   : > { %1211 = vst [vmem:[%s1828_s11 + $0x98] sm:$0xff] %v1141_v57  ;;  %v1133_v59 = vadd.f32 %v1823_v17, %v1132_v58 }
 0x298   : > { %v1530_v60 = vpop.f32.mrf.mxu0 }
 0x299   : > { %1209 = vst [vmem:[%s1828_s11 + $0x88] sm:$0xff] %v1133_v59  ;;  %v1154_v61 = vadd.f32 %v1530_v60, %v1823_v17 }
 0x29a   : > { %v1145_v40 = vpop.f32.mrf.mxu0 }
 0x29b   : > { %1214 = vst [vmem:[%s1828_s11 + $0xb0] sm:$0xff] %v1154_v61  ;;  %v1146_v62 = vadd.f32 %v1823_v17, %v1145_v40 }
 0x29c   : > { %v1531_v63 = vpop.f32.mrf.mxu0 }
 0x29d   : > { %1212 = vst [vmem:[%s1828_s11 + $0xa0] sm:$0xff] %v1146_v62  ;;  %v1157_v0 = vadd.f32 %v1531_v63, %v1823_v17 }
 0x29e   : > { %v1148_v1 = vpop.f32.mrf.mxu0 }
 0x29f   : > { %1215 = vst [vmem:[%s1828_s11 + $0xb8] sm:$0xff] %v1157_v0  ;;  %v1149_v2 = vadd.f32 %v1823_v17, %v1148_v1 }
 0x2a0   : > { %v1534_v4 = vpop.f32.mrf.mxu0 }
 0x2a1   : > { %1213 = vst [vmem:[%s1828_s11 + $0xa8] sm:$0xff] %v1149_v2  ;;  %v1170_v5 = vadd.f32 %v1534_v4, %v1823_v17 }
 0x2a2   : > { %v1161_v6 = vpop.f32.mrf.mxu0 }
 0x2a3   : > { %1218 = vst [vmem:[%s1828_s11 + $0xd0] sm:$0xff] %v1170_v5  ;;  %v1162_v7 = vadd.f32 %v1823_v17, %v1161_v6 }
 0x2a4   : > { %v1535_v8 = vpop.f32.mrf.mxu0 }
 0x2a5   : > { %1216 = vst [vmem:[%s1828_s11 + $0xc0] sm:$0xff] %v1162_v7  ;;  %v1173_v9 = vadd.f32 %v1535_v8, %v1823_v17 }
 0x2a6   : > { %v1164_v10 = vpop.f32.mrf.mxu0 }
 0x2a7   : > { %1219 = vst [vmem:[%s1828_s11 + $0xd8] sm:$0xff] %v1173_v9  ;;  %v1165_v11 = vadd.f32 %v1823_v17, %v1164_v10 }
 0x2a8   : > { %v1538_v12 = vpop.f32.mrf.mxu0 }
 0x2a9   : > { %1217 = vst [vmem:[%s1828_s11 + $0xc8] sm:$0xff] %v1165_v11  ;;  %v1186_v13 = vadd.f32 %v1538_v12, %v1823_v17 }
 0x2aa   : > { %v1177_v14 = vpop.f32.mrf.mxu0 }
 0x2ab   : > { %1222 = vst [vmem:[%s1828_s11 + $0xf0] sm:$0xff] %v1186_v13  ;;  %v1178_v15 = vadd.f32 %v1823_v17, %v1177_v14 }
 0x2ac   : > { %v1539_v34 = vpop.f32.mrf.mxu0 }
 0x2ad   : > { %1220 = vst [vmem:[%s1828_s11 + $0xe0] sm:$0xff] %v1178_v15  ;;  %v1189_v37 = vadd.f32 %v1539_v34, %v1823_v17 }
 0x2ae   : > { %v1180_v16 = vpop.f32.mrf.mxu0 }
 0x2af   : > { %1223 = vst [vmem:[%s1828_s11 + $0xf8] sm:$0xff] %v1189_v37  ;;  %v1181_v3 = vadd.f32 %v1823_v17, %v1180_v16 }
 0x2b1   : > { %1221 = vst [vmem:[%s1828_s11 + $0xe8] sm:$0xff] %v1181_v3 }
 0x2b2 PF: > { %s17_s24 = sadd.s32 1, %s1593_s24  }
 0x2b3   : > { %p14_p4 = scmp.ge.s32.totalorder %s17_s24, 4  }
 0x2b5   :  { %16 = sbr.rel (!%p14_p4) target bundleno = 1 (0x1), region = 78 }

</bundles_post_ra>
